<compile_context>
chip_gen: v6e
topology: v6e:2x2x1
jax: 0.10.0
libtpu: 0.0.40
codegen_flags: <defaults>
</compile_context>

<pallas_src>
import functools

import jax
import jax.numpy as jnp
from jax.experimental import pallas as pl
from jax.experimental.pallas import tpu as pltpu


def _decomp_kernel(x_ref, res_ref, mean_ref, xpad_ref, *, kernel_size, pad, seq_len):
    # x_ref / res_ref / mean_ref: (L, TC); xpad_ref: (L + 2*pad, TC) f32 scratch.
    xv = x_ref[...].astype(jnp.float32)

    # Build the edge-replicated series in VMEM (no HBM copy of the padded series).
    xpad_ref[pl.ds(pad, seq_len), :] = xv
    if pad > 0:
        front = jnp.broadcast_to(xv[0:1, :], (pad, xv.shape[1]))
        end = jnp.broadcast_to(xv[seq_len - 1:seq_len, :], (pad, xv.shape[1]))
        xpad_ref[pl.ds(0, pad), :] = front
        xpad_ref[pl.ds(seq_len + pad, pad), :] = end

    # Moving average = sum of k statically shifted windows
    # (== AvgPool1d(kernel_size, stride=1, padding=0) on the replicated series).
    # The center window (j == pad) is x itself and stays in registers.
    acc = xv
    for j in range(kernel_size):
        if j == pad:
            continue
        acc = acc + xpad_ref[pl.ds(j, seq_len), :]
    mean = acc * (1.0 / kernel_size)

    mean_ref[...] = mean.astype(mean_ref.dtype)
    res_ref[...] = (xv - mean).astype(res_ref.dtype)


def _channel_tile(L, C):
    # Lane-aligned channel tiles when possible; otherwise a single full-width
    # tile (block last dim must be a multiple of 128 or equal to the full dim).
    if C % 128 == 0 and C > 128:
        if C % 512 == 0 and L * 512 * 4 <= 4 * 1024 * 1024:
            return 512  # bigger tile amortizes per-grid-step overhead
        return 128
    return C


def series_decomp(x, kernel_size):
    """res, moving_mean = series_decomp(kernel_size)(x)   with x: (B, L, C)."""
    assert kernel_size % 2 == 1, "kernel_size must be odd so res = x - mean is shape-valid"
    B, L, C = x.shape
    pad = (kernel_size - 1) // 2

    TC = _channel_tile(L, C)
    n_c = C // TC

    kernel = functools.partial(
        _decomp_kernel, kernel_size=kernel_size, pad=pad, seq_len=L)

    res, mean = pl.pallas_call(
        kernel,
        out_shape=(
            jax.ShapeDtypeStruct((B, L, C), x.dtype),
            jax.ShapeDtypeStruct((B, L, C), x.dtype),
        ),
        grid=(B, n_c),
        in_specs=[
            pl.BlockSpec((None, L, TC), lambda b, c: (b, 0, c)),
        ],
        out_specs=(
            pl.BlockSpec((None, L, TC), lambda b, c: (b, 0, c)),
            pl.BlockSpec((None, L, TC), lambda b, c: (b, 0, c)),
        ),
        scratch_shapes=[pltpu.VMEM((L + 2 * pad, TC), jnp.float32)],
        compiler_params=pltpu.CompilerParams(
            dimension_semantics=("parallel", "parallel")),
    )(x)
    return res, mean


def _reference(x, kernel_size):
    # Pure-JAX reference mirroring the PyTorch forward.
    pad = (kernel_size - 1) // 2
    front = jnp.repeat(x[:, 0:1, :], pad, axis=1)
    end = jnp.repeat(x[:, -1:, :], pad, axis=1)
    xp = jnp.concatenate([front, x, end], axis=1)
    L = x.shape[1]
    windows = jnp.stack([xp[:, j:j + L, :] for j in range(kernel_size)], axis=0)
    mean = jnp.mean(windows, axis=0)
    return x - mean, mean


if __name__ == "__main__":
    key = jax.random.PRNGKey(0)
    B, L, C = 2, 16, 8
    kernel_size = 5  # series_decomp(kernel_size=5)

    x = jax.random.normal(key, (B, L, C), dtype=jnp.float32)

    res, moving_mean = series_decomp(x, kernel_size)
    res = jax.block_until_ready(res)
    moving_mean = jax.block_until_ready(moving_mean)

    res_ref, mean_ref = _reference(x, kernel_size)
    assert res.shape == (B, L, C) and moving_mean.shape == (B, L, C)
    assert jnp.allclose(res, res_ref, atol=1e-5, rtol=1e-5)
    assert jnp.allclose(moving_mean, mean_ref, atol=1e-5, rtol=1e-5)

    print("KERNEL_OK")
</pallas_src>

<mosaic_0001>
module attributes {stable_mosaic.version = 11 : i64} {
  func.func @_decomp_kernel(%arg0: i32, %arg1: i32, %arg2: memref<1x16x8xf32, #tpu.memory_space<vmem>>, %arg3: memref<1x16x8xf32, #tpu.memory_space<vmem>>, %arg4: memref<1x16x8xf32, #tpu.memory_space<vmem>>, %arg5: memref<20x8xf32, #tpu.memory_space<vmem>>) attributes {dimension_semantics = [#tpu.dimension_semantics<parallel>, #tpu.dimension_semantics<parallel>], iteration_bounds = array<i64: 2, 1>, scalar_prefetch = 0 : i64, scratch_operands = 1 : i64, tpu.core_type = #tpu.core_type<tc>, window_params = [{transform_indices = @transform_0, window_bounds = array<i64: 1, 16, 8>}, {transform_indices = @transform_1, window_bounds = array<i64: 1, 16, 8>}, {transform_indices = @transform_2, window_bounds = array<i64: 1, 16, 8>}]} {
    %c0 = arith.constant 0 : index
    %c0_0 = arith.constant 0 : index
    %c0_1 = arith.constant 0 : index
    %0 = vector.load %arg2[%c0, %c0_0, %c0_1] : memref<1x16x8xf32, #tpu.memory_space<vmem>>, vector<1x16x8xf32>
    %1 = vector.shape_cast %0 : vector<1x16x8xf32> to vector<16x8xf32>
    %c2 = arith.constant 2 : index
    %c0_2 = arith.constant 0 : index
    %2 = vector.load %arg5[%c2, %c0_2] : memref<20x8xf32, #tpu.memory_space<vmem>>, vector<16x8xf32>
    tpu.vector_store %arg5[%c2, %c0_2], %1 {strides = array<i32>} : memref<20x8xf32, #tpu.memory_space<vmem>>, vector<16x8xf32>,
    %3 = vector.extract_strided_slice %1 {offsets = [0, 0], sizes = [1, 8], strides = [1, 1]} : vector<16x8xf32> to vector<1x8xf32>
    %4 = vector.shape_cast %3 : vector<1x8xf32> to vector<1x8xf32>
    %5 = vector.broadcast %4 : vector<1x8xf32> to vector<2x8xf32>
    %6 = vector.extract_strided_slice %1 {offsets = [15, 0], sizes = [1, 8], strides = [1, 1]} : vector<16x8xf32> to vector<1x8xf32>
    %7 = vector.shape_cast %6 : vector<1x8xf32> to vector<1x8xf32>
    %8 = vector.broadcast %7 : vector<1x8xf32> to vector<2x8xf32>
    %c0_3 = arith.constant 0 : index
    %c0_4 = arith.constant 0 : index
    %9 = vector.load %arg5[%c0_3, %c0_4] : memref<20x8xf32, #tpu.memory_space<vmem>>, vector<2x8xf32>
    tpu.vector_store %arg5[%c0_3, %c0_4], %5 {strides = array<i32>} : memref<20x8xf32, #tpu.memory_space<vmem>>, vector<2x8xf32>,
    %c18 = arith.constant 18 : index
    %c0_5 = arith.constant 0 : index
    %10 = vector.load %arg5[%c18, %c0_5] : memref<20x8xf32, #tpu.memory_space<vmem>>, vector<2x8xf32>
    tpu.vector_store %arg5[%c18, %c0_5], %8 {strides = array<i32>} : memref<20x8xf32, #tpu.memory_space<vmem>>, vector<2x8xf32>,
    %c0_6 = arith.constant 0 : index
    %c0_7 = arith.constant 0 : index
    %11 = vector.load %arg5[%c0_6, %c0_7] : memref<20x8xf32, #tpu.memory_space<vmem>>, vector<16x8xf32>
    %12 = arith.addf %1, %11 : vector<16x8xf32>
    %c1 = arith.constant 1 : index
    %c0_8 = arith.constant 0 : index
    %13 = vector.load %arg5[%c1, %c0_8] : memref<20x8xf32, #tpu.memory_space<vmem>>, vector<16x8xf32>
    %14 = arith.addf %12, %13 : vector<16x8xf32>
    %c3 = arith.constant 3 : index
    %c0_9 = arith.constant 0 : index
    %15 = vector.load %arg5[%c3, %c0_9] : memref<20x8xf32, #tpu.memory_space<vmem>>, vector<16x8xf32>
    %16 = arith.addf %14, %15 : vector<16x8xf32>
    %c4 = arith.constant 4 : index
    %c0_10 = arith.constant 0 : index
    %17 = vector.load %arg5[%c4, %c0_10] : memref<20x8xf32, #tpu.memory_space<vmem>>, vector<16x8xf32>
    %18 = arith.addf %16, %17 : vector<16x8xf32>
    %cst = arith.constant 2.000000e-01 : f32
    %19 = vector.broadcast %cst : f32 to vector<16x8xf32>
    %20 = arith.mulf %18, %19 : vector<16x8xf32>
    %c0_11 = arith.constant 0 : index
    %c0_12 = arith.constant 0 : index
    %c0_13 = arith.constant 0 : index
    %21 = vector.load %arg4[%c0_11, %c0_12, %c0_13] : memref<1x16x8xf32, #tpu.memory_space<vmem>>, vector<1x16x8xf32>
    %22 = vector.shape_cast %21 : vector<1x16x8xf32> to vector<16x8xf32>
    %23 = vector.shape_cast %20 : vector<16x8xf32> to vector<1x16x8xf32>
    tpu.vector_store %arg4[%c0_11, %c0_12, %c0_13], %23 {strides = array<i32>} : memref<1x16x8xf32, #tpu.memory_space<vmem>>, vector<1x16x8xf32>,
    %24 = arith.subf %1, %20 : vector<16x8xf32>
    %c0_14 = arith.constant 0 : index
    %c0_15 = arith.constant 0 : index
    %c0_16 = arith.constant 0 : index
    %25 = vector.load %arg3[%c0_14, %c0_15, %c0_16] : memref<1x16x8xf32, #tpu.memory_space<vmem>>, vector<1x16x8xf32>
    %26 = vector.shape_cast %25 : vector<1x16x8xf32> to vector<16x8xf32>
    %27 = vector.shape_cast %24 : vector<16x8xf32> to vector<1x16x8xf32>
    tpu.vector_store %arg3[%c0_14, %c0_15, %c0_16], %27 {strides = array<i32>} : memref<1x16x8xf32, #tpu.memory_space<vmem>>, vector<1x16x8xf32>,
    return
  }
  func.func @transform_0(%arg0: i32, %arg1: i32) -> (i32, i32, i32) {
    %c0_i32 = arith.constant 0 : i32
    %c0_i32_0 = arith.constant 0 : i32
    return %arg0, %c0_i32, %arg1 : i32, i32, i32
  }
  func.func @transform_1(%arg0: i32, %arg1: i32) -> (i32, i32, i32) {
    %c0_i32 = arith.constant 0 : i32
    %c0_i32_0 = arith.constant 0 : i32
    return %arg0, %c0_i32, %arg1 : i32, i32, i32
  }
  func.func @transform_2(%arg0: i32, %arg1: i32) -> (i32, i32, i32) {
    %c0_i32 = arith.constant 0 : i32
    %c0_i32_0 = arith.constant 0 : i32
    return %arg0, %c0_i32, %arg1 : i32, i32, i32
  }
}

</mosaic_0001>

<bundles_post_ra>
// kernel: tpu_custom_call.1
= control target key start
LH: loop header
LB: loop body
LE: loop exit
PB: predicated region body
PF: predicated region fallthrough
CT: control target
= control target key end

     0   :  { %s445_s9 = smov 0   ;;  %s447_s10 = smov 0   ;;  %s492_s0 = inlined_call_operand.vmem [shape: f32[2,16,8], index: 0, kind: input, shape index: {}]   ;;  %s493_s1 = inlined_call_operand.vmem [shape: f32[2,16,8], index: 1, kind: output, shape index: {0}]   ;;  %s494_s2 = inlined_call_operand.vmem [shape: f32[2,16,8], index: 2, kind: output, shape index: {1}]  }
   0x1   :  { %s449_s11 = smov 0  }
   0x2 LB: > { %s25_s12 = sadd.s32 1, %s424_s10  ;;  %p370_p0 = scmp.ge.s32.totalorder %s428_s11, 1  ;;  %s428_s11 = sphi %s449_s11, %s13_s11   ;;  %s424_s10 = sphi %s447_s10, %s496_s10   ;;  %s420_s9 = sphi %s445_s9, %s495_s9  }
   0x3   : > { %p27_p1 = scmp.ge.s32.totalorder %s25_s12, 2  ;;  %p136_p2 = scmp.lt.s32.totalorder %s428_s11, 3 }
   0x5   : > { %s498_s12 = smov (%p27_p1, %s25_s12), 0  ;;  %p137_p3 = pnand %p370_p0, %p136_p2 }
   0x6   : > { %p172_p4 = scmp.lt.s32.totalorder (!%p137_p3), %s420_s9, 1 }
   0x7   : > { %140 = sbr.rel (%p137_p3) target bundleno = 41 (0x29), region = 24 }
   0xc   : > { %v201_v0 = vlaneseq  ;;  %s500_s9 = smov (!%p172_p4, %s420_s9), 1  ;;  %vm198_vm0 = vcmask 64512   ;;  %vm209_vm1 = vcmask 58368  }
   0xd   : > { %s463_s13 = sshll.u32 %s500_s9, 4 }
   0xe   : > { %v202_v1 = vshrl.u32 %v201_v0, 7  ;;  %s179_s16 = scalar_lea.vmem %s492_s0, %s463_s13  ;;  %s195_s19 = scalar_lea.vmem %s494_s2, %s463_s13 }
   0xf   : > { %v196_v4 = vld [vmem:[%s179_s16] sm:$0xff]  ;;  %v197_v5 = vld [vmem:[%s179_s16 + $0x8] sm:$0xff]  ;;  %s187_s22 = scalar_lea.vmem %s493_s1, %s463_s13 }
  0x10   : > { %v203_v2 = vsub.s32 0, %v202_v1  ;;  %v207_v3 = vsub.s32 7, %v202_v1  ;;  %199 = vst.msk [vmem:[#allocation2 + $0x2] sm:$0xff] %vm198_vm0, %v196_v4  ;;  %200 = vst.msk [vmem:[#allocation2 + $0xa] sm:$0xff] %vm198_vm0, %v197_v5 }
  0x12   : > { %v204_v6 = vrot.slane %v196_v4, %v203_v2  ;;  %v208_v7 = vrot.slane %v197_v5, %v207_v3 }
  0x14   : > { %210 = vst.msk [vmem:[#allocation2] sm:$0x3] %vm209_vm1, %v204_v6  ;;  %211 = vst.msk [vmem:[#allocation2 + $0x12] sm:$0x3] %vm209_vm1, %v208_v7 }
  0x17   : > { %v213_v8 = vld [vmem:[#allocation2 + $0x8] sm:$0xff] }
  0x18   : > { %v217_v9 = vld [vmem:[#allocation2 + $0x9] sm:$0xff]  ;;  %v215_v10 = vadd.f32 %v213_v8, %v197_v5 }
  0x19   : > { %v220_v19 = vld [vmem:[#allocation2 + $0x3] sm:$0xff] }
  0x1a   : > { %v219_v12 = vadd.f32 %v217_v9, %v215_v10  ;;  %v224_v22 = vld [vmem:[#allocation2 + $0x4] sm:$0xff] }
  0x1b   : > { %v212_v11 = vld [vmem:[#allocation2] sm:$0xff]  ;;  %v221_v14 = vld [vmem:[#allocation2 + $0xb] sm:$0xff] }
  0x1c   : > { %v214_v13 = vadd.f32 %v212_v11, %v196_v4  ;;  %v216_v15 = vld [vmem:[#allocation2 + $0x1] sm:$0xff]  ;;  %v223_v16 = vadd.f32 %v221_v14, %v219_v12  ;;  %v225_v18 = vld [vmem:[#allocation2 + $0xc] sm:$0xff] }
  0x1e   : > { %v218_v17 = vadd.f32 %v216_v15, %v214_v13  ;;  %v227_v20 = vadd.f32 %v225_v18, %v223_v16 }
  0x20   : > { %v222_v21 = vadd.f32 %v220_v19, %v218_v17  ;;  %v229_v23 = vmul.f32 0.2, %v227_v20 }
  0x22   : > { %v226_v24 = vadd.f32 %v224_v22, %v222_v21  ;;  %231 = vst.msk [vmem:[%s195_s19 + $0x8] sm:$0xff] %vm198_vm0, %v229_v23  ;;  %v233_v26 = vsub.f32 %v197_v5, %v229_v23 }
  0x24   : > { %v228_v25 = vmul.f32 0.2, %v226_v24  ;;  %235 = vst.msk [vmem:[%s187_s22 + $0x8] sm:$0xff] %vm198_vm0, %v233_v26 }
  0x26   : > { %230 = vst.msk [vmem:[%s195_s19] sm:$0xff] %vm198_vm0, %v228_v25  ;;  %v232_v27 = vsub.f32 %v196_v4, %v228_v25 }
  0x28   : > { %234 = vst.msk [vmem:[%s187_s22] sm:$0xff] %vm198_vm0, %v232_v27 }
  0x29 PF: > { %s13_s11 = sadd.s32 1, %s428_s11   ;;  %s495_s9 = smov %s424_s10 }
  0x2a   : > { %p10_p5 = scmp.ge.s32.totalorder %s13_s11, 4   ;;  %s496_s10 = smov %s498_s12 }
  0x2c   :  { %12 = sbr.rel (!%p10_p5) target bundleno = 2 (0x2), region = 66 }

</bundles_post_ra>
